<compile_context>
chip_gen: v5e
topology: v5e:2x2
jax: 0.10.0
libtpu: 0.0.40
codegen_flags: <defaults>
</compile_context>

<pallas_src>
import functools

import jax
import jax.numpy as jnp
from jax.experimental import pallas as pl
from jax.experimental.pallas import tpu as pltpu


def _rmsnorm_kernel(x_ref, w_ref, o_ref, *, eps: float, inv_dim: float):
    # x_ref: (block_rows, dim), w_ref: (1, dim), o_ref: (block_rows, dim)
    x = x_ref[...].astype(jnp.float32)
    # mean of squares over the feature (lane) axis; 1/dim folded as a constant.
    ms = jnp.sum(x * x, axis=-1, keepdims=True) * inv_dim
    inv_norm = jax.lax.rsqrt(ms + eps)  # (br, 1) f32 -- EUP slot
    w = w_ref[...].astype(jnp.float32)  # (1, dim)
    # Re-read x for the output so the first full-tile f32 upcast need not stay
    # live across the reduction (smaller f32 footprint -> larger row tiles).
    xo = x_ref[...].astype(jnp.float32)
    o_ref[...] = (xo * inv_norm * w).astype(o_ref.dtype)


def _sublane_packing(dtype) -> int:
    itemsize = jnp.dtype(dtype).itemsize
    return {4: 8, 2: 16, 1: 32}.get(itemsize, 8)


def _tpu_core_info() -> tuple[int, int]:
    """Return (per-TensorCore VMEM bytes, TensorCores per chip), conservatively."""
    kind = ""
    try:
        kind = jax.devices()[0].device_kind.lower()
    except Exception:
        pass

    if "v7" in kind:
        per_tc_vmem, n_tc = 64 * 1024 * 1024, 2
    elif ("v6" in kind) or ("v5e" in kind) or ("v5 lite" in kind) or ("v5lite" in kind):
        per_tc_vmem, n_tc = 128 * 1024 * 1024, 1
    else:
        # Unknown chip: assume the smallest per-TC VMEM in the fleet and a
        # megacore, which is safe (never over-budgets, still shards the grid).
        per_tc_vmem, n_tc = 64 * 1024 * 1024, 2

    try:
        reported = int(pltpu.get_tpu_info().vmem_capacity_bytes)
        # get_tpu_info may report the per-chip figure on multi-TC parts; the
        # per-TC cap above is the hard clamp, never exceed it.
        per_tc_vmem = min(per_tc_vmem, reported)
    except Exception:
        pass
    return per_tc_vmem, n_tc


def _bytes_per_row(dim: int, in_itemsize: int, out_itemsize: int) -> int:
    # Double-buffered input tile + double-buffered output tile + f32 temps
    # (upcast / product) inside the kernel body.
    return dim * (2 * in_itemsize + 2 * out_itemsize + 3 * 4)


def _pick_block_rows(rows: int, dim: int, dtype, per_tc_vmem: int, n_tc: int) -> int:
    """Largest sublane-aligned row tile fitting the per-TensorCore VMEM budget."""
    sublane = _sublane_packing(dtype)
    itemsize = jnp.dtype(dtype).itemsize

    # v7x (64 MiB/TC): leave half for compiler scratch / pipeline headroom.
    # v5e/v6e (128 MiB): be more aggressive, ~65%.
    frac = 0.5 if n_tc > 1 else 0.65
    budget = int(per_tc_vmem * frac)

    bpr = _bytes_per_row(dim, itemsize, itemsize)
    br = max(sublane, budget // max(1, bpr))
    br = max(sublane, (br // sublane) * sublane)

    if br >= rows:
        # Whole input fits one tile: a full-extent block is always layout-legal.
        br = rows

    # Megacore (v7x): require >= 2 grid steps per TensorCore when rows allow,
    # so each core keeps its DMA/compute double-buffer overlap. On 1-TC chips
    # never shrink the tile just to manufacture extra steps.
    if n_tc >= 2:
        min_steps = 2 * n_tc
        if pl.cdiv(rows, br) < min_steps and rows >= min_steps * sublane:
            br = max(sublane, (pl.cdiv(rows, min_steps) // sublane) * sublane)

    return br


def rmsnorm(x: jax.Array, weight: jax.Array, eps: float = 1e-6,
            block_rows: int | None = None) -> jax.Array:
    """RMSNorm over the last axis of x, scaled by `weight` (shape (dim,))."""
    orig_shape = x.shape
    dim = orig_shape[-1]
    rows = 1
    for s in orig_shape[:-1]:
        rows *= s

    x2d = x.reshape(rows, dim)
    w2d = weight.reshape(1, dim)

    sublane = _sublane_packing(x.dtype)
    itemsize = jnp.dtype(x.dtype).itemsize
    per_tc_vmem, n_tc = _tpu_core_info()

    if block_rows is not None:
        br = int(block_rows)
        if br >= rows:
            br = rows
        else:
            br = max(sublane, (br // sublane) * sublane)
            br = min(br, rows)
    else:
        br = _pick_block_rows(rows, dim, x.dtype, per_tc_vmem, n_tc)

    # No padding / no output slice: cdiv grid + BlockSpec edge masking handles
    # ragged row counts (rows are independent; tail garbage is never stored).
    grid = (pl.cdiv(rows, br),)

    # Explicit VMEM limit sized from the same per-row cost used to pick br,
    # so it is consistent with (and never below) the double-buffered tiles.
    need = (br * _bytes_per_row(dim, itemsize, itemsize)   # tiles + f32 temps
            + 2 * dim * 4                                   # resident weight
            + (1 << 20))                                    # misc slack
    vmem_limit = int(min(per_tc_vmem, max(32 * 1024 * 1024, need)))

    kernel = functools.partial(_rmsnorm_kernel, eps=float(eps),
                               inv_dim=1.0 / float(dim))

    out = pl.pallas_call(
        kernel,
        out_shape=jax.ShapeDtypeStruct((rows, dim), x.dtype),
        grid_spec=pltpu.PrefetchScalarGridSpec(
            num_scalar_prefetch=0,
            grid=grid,
            in_specs=[
                pl.BlockSpec((br, dim), lambda i: (i, 0)),   # x row tile
                pl.BlockSpec((1, dim), lambda i: (0, 0)),    # weight, resident
            ],
            out_specs=pl.BlockSpec((br, dim), lambda i: (i, 0)),
        ),
        compiler_params=pltpu.CompilerParams(
            dimension_semantics=("parallel",),
            vmem_limit_bytes=vmem_limit,
        ),
    )(x2d, w2d)

    return out.reshape(orig_shape)


def _reference(x, weight, eps):
    norm = jnp.sqrt(jnp.mean(x.astype(jnp.float32) ** 2, axis=-1, keepdims=True) + eps)
    return (weight * (x / norm)).astype(x.dtype)


if __name__ == "__main__":
    key = jax.random.PRNGKey(0)
    eps = 1e-6

    # Case 1: module-default weight (ones), small (batch, seq, dim).
    batch, seq, dim = 2, 8, 32
    k1, k2, k3 = jax.random.split(key, 3)
    x = jax.random.normal(k1, (batch, seq, dim), dtype=jnp.float32)
    weight = jnp.ones((dim,), dtype=jnp.float32)  # nn.Parameter(torch.ones(dim))

    out = jax.block_until_ready(rmsnorm(x, weight, eps=eps))
    ref = _reference(x, weight, eps)
    assert out.shape == x.shape
    assert jnp.allclose(out, ref, atol=1e-5, rtol=1e-5), "mismatch vs reference (ones weight)"

    # Case 2: non-trivial weight, ragged row count (rows=15), auto tile size.
    batch2, seq2 = 3, 5
    x2 = jax.random.normal(k2, (batch2, seq2, dim), dtype=jnp.float32)
    w2 = 1.0 + 0.1 * jax.random.normal(k3, (dim,), dtype=jnp.float32)

    out2 = jax.block_until_ready(rmsnorm(x2, w2, eps=eps))
    ref2 = _reference(x2, w2, eps)
    assert out2.shape == x2.shape
    assert jnp.allclose(out2, ref2, atol=1e-5, rtol=1e-5), "mismatch vs reference (ragged rows)"

    # Case 3: force a multi-step grid with a partial (masked) edge block:
    # rows=15, block_rows=8 -> grid of 2 with a 7-row masked tail.
    out3 = jax.block_until_ready(rmsnorm(x2, w2, eps=eps, block_rows=8))
    assert out3.shape == x2.shape
    assert jnp.allclose(out3, ref2, atol=1e-5, rtol=1e-5), "mismatch vs reference (masked edge block)"

    print("KERNEL_OK")
</pallas_src>

<mosaic_0001>
module attributes {stable_mosaic.version = 11 : i64} {
  func.func @_rmsnorm_kernel(%arg0: i32, %arg1: memref<16x32xf32, #tpu.memory_space<vmem>>, %arg2: memref<1x32xf32, #tpu.memory_space<vmem>>, %arg3: memref<16x32xf32, #tpu.memory_space<vmem>>) attributes {dimension_semantics = [#tpu.dimension_semantics<parallel>], iteration_bounds = array<i64: 1>, scalar_prefetch = 0 : i64, scratch_operands = 0 : i64, tpu.core_type = #tpu.core_type<tc>, window_params = [{transform_indices = @transform_0, window_bounds = array<i64: 16, 32>}, {pipeline_mode = #tpu.pipeline_mode<synchronous>, transform_indices = @transform_1, window_bounds = array<i64: 1, 32>}, {transform_indices = @transform_2, window_bounds = array<i64: 16, 32>}]} {
    %c0 = arith.constant 0 : index
    %c0_0 = arith.constant 0 : index
    %0 = vector.load %arg1[%c0, %c0_0] : memref<16x32xf32, #tpu.memory_space<vmem>>, vector<16x32xf32>
    %1 = arith.mulf %0, %0 : vector<16x32xf32>
    %cst = arith.constant dense<0.000000e+00> : vector<16xf32>
    %2 = vector.multi_reduction <add>, %1, %cst [1] : vector<16x32xf32> to vector<16xf32>
    %3 = vector.shape_cast %2 : vector<16xf32> to vector<16x1xf32>
    %cst_1 = arith.constant 3.125000e-02 : f32
    %4 = vector.broadcast %cst_1 : f32 to vector<16x1xf32>
    %5 = arith.mulf %3, %4 : vector<16x1xf32>
    %cst_2 = arith.constant 9.99999997E-7 : f32
    %6 = vector.broadcast %cst_2 : f32 to vector<16x1xf32>
    %7 = arith.addf %5, %6 : vector<16x1xf32>
    %8 = math.rsqrt %7 : vector<16x1xf32>
    %c0_3 = arith.constant 0 : index
    %c0_4 = arith.constant 0 : index
    %9 = vector.load %arg2[%c0_3, %c0_4] : memref<1x32xf32, #tpu.memory_space<vmem>>, vector<1x32xf32>
    %c0_5 = arith.constant 0 : index
    %c0_6 = arith.constant 0 : index
    %10 = vector.load %arg1[%c0_5, %c0_6] : memref<16x32xf32, #tpu.memory_space<vmem>>, vector<16x32xf32>
    %11 = vector.broadcast %8 : vector<16x1xf32> to vector<16x32xf32>
    %12 = arith.mulf %10, %11 : vector<16x32xf32>
    %13 = vector.broadcast %9 : vector<1x32xf32> to vector<16x32xf32>
    %14 = arith.mulf %12, %13 : vector<16x32xf32>
    %c0_7 = arith.constant 0 : index
    %c0_8 = arith.constant 0 : index
    %15 = vector.load %arg3[%c0_7, %c0_8] : memref<16x32xf32, #tpu.memory_space<vmem>>, vector<16x32xf32>
    tpu.vector_store %arg3[%c0_7, %c0_8], %14 {strides = array<i32>} : memref<16x32xf32, #tpu.memory_space<vmem>>, vector<16x32xf32>,
    return
  }
  func.func @transform_0(%arg0: i32) -> (i32, i32) {
    %c0_i32 = arith.constant 0 : i32
    %c0_i32_0 = arith.constant 0 : i32
    return %arg0, %c0_i32 : i32, i32
  }
  func.func @transform_1(%arg0: i32) -> (i32, i32) {
    %c0_i32 = arith.constant 0 : i32
    %c0_i32_0 = arith.constant 0 : i32
    %c0_i32_1 = arith.constant 0 : i32
    return %c0_i32, %c0_i32_0 : i32, i32
  }
  func.func @transform_2(%arg0: i32) -> (i32, i32) {
    %c0_i32 = arith.constant 0 : i32
    %c0_i32_0 = arith.constant 0 : i32
    return %arg0, %c0_i32 : i32, i32
  }
}

</mosaic_0001>

<bundles_post_ra>
// kernel: tpu_custom_call.1
= control target key start
LH: loop header
LB: loop body
LE: loop exit
PB: predicated region body
PF: predicated region fallthrough
CT: control target
= control target key end

     0   :  { %7 = vsyncpa [#allocation3], 0  ;;  %s234_s0 = inlined_call_operand.hbm [shape: f32[16,32], index: 0, kind: input, shape index: {}]   ;;  %s235_s1 = inlined_call_operand.hbm [shape: f32[1,32], index: 1, kind: input, shape index: {}]   ;;  %s236_s2 = inlined_call_operand.hbm [shape: f32[16,32], index: 2, kind: output, shape index: {}]  }
   0x1   :  { %8 = vsyncpa [#allocation6], 0 }
   0x2   :  { %9 = vsyncpa [#allocation4], 0  ;;  %s14_s11 = sshll.u32 %s234_s0, 4  ;;  %s195_s12 = smov [#allocation2]   ;;  %s15_s11 = int_to_ptr.hbm [resolvable:$true] %s14_s11 }
   0x3   :  { %s16_s13 = sshll.u32 %s195_s12, 4  ;;  %s28_s16 = sshll.u32 %s235_s1, 4  ;;  %s17_s13 = int_to_ptr.vmem [resolvable:$true] %s16_s13  ;;  %s29_s16 = int_to_ptr.hbm [resolvable:$true] %s28_s16 }
   0x4   :  { %s196_s17 = smov 128   ;;  %s197_s18 = smov 8  }
   0x5   :  { %22 = dma.hbm_to_vmem [thread:$0]  %s15_s11, 256, %s17_s13, [#allocation3], %s196_s17, %s196_s17, %s197_s18  }
   0x6   :  { %s198_s19 = smov [#allocation5]  }
   0x7   :  { %s30_s20 = sshll.u32 %s198_s19, 4  ;;  %s31_s20 = int_to_ptr.vmem [resolvable:$true] %s30_s20 }
   0x8   :  { %33 = dma.hbm_to_vmem [thread:$0]  %s29_s16, 16, %s31_s20, [#allocation6]  }
   0x9   :  { %189 = dma.done.wait [#allocation3], 256  }
   0xa   :  { %190 = vsyncadd [#allocation3], 4294967040 }
   0xb   :  { %191 = dma.done.wait [#allocation6], 16  }
   0xc   :  { %192 = vsyncadd [#allocation6], 4294967280  ;;  %v42_v0 = vld [vmem:[#allocation2] sm:$0xff]  ;;  %vm46_vm0 = vcmask 261120   ;;  %v43_v2 = vld [vmem:[#allocation2 + $0x8] sm:$0xff]  ;;  %s199_s0 = smov [#allocation7]  }
   0xd   :  { %v44_v1 = vmul.f32 %v42_v0, %v42_v0  ;;  %v45_v4 = vmul.f32 %v43_v2, %v43_v2  ;;  %v112_v20 = vld [vmem:[#allocation5] ss:$0 sm:$0xff]  ;;  %s91_s1 = sshll.u32 %s199_s0, 4  ;;  %s93_s23 = sshll.u32 %s236_s2, 4  ;;  %s92_s1 = int_to_ptr.vmem [resolvable:$true] %s91_s1  ;;  %s94_s23 = int_to_ptr.hbm [resolvable:$true] %s93_s23 }
   0xf   :  { %v47_v3 = vsel %vm46_vm0, %v44_v1, 0.0  ;;  %v50_v5 = vsel %vm46_vm0, %v45_v4, 0.0 }
  0x10   :  { %48 = vadd.xlane.f32.xlu0 %v47_v3 }
  0x18   :  { %51 = vadd.xlane.f32.xlu0 %v50_v5 }
  0x83   :  { %v49_v6 = vpop.xlane.xlu0 %48 }
  0x84   :  { %v53_v7 = vmul.f32 0.03125, %v49_v6 }
  0x86   :  { %v55_v8 = vadd.f32 1e-06, %v53_v7 }
  0x88   :  { %113 = vrsqrt.f32 %v55_v8  ;;  %vm63_vm2 = vweird.f32 %v55_v8 }
  0x8b   :  { %v52_v9 = vpop.xlane.xlu0 %51 }
  0x8c   :  { %v54_v10 = vmul.f32 0.03125, %v52_v9 }
  0x8e   :  { %v114_v11 = vpop.eup %113  ;;  %v56_v12 = vadd.f32 1e-06, %v54_v10 }
  0x8f   :  { %v58_v13 = vmul.f32 %v114_v11, %v55_v8  ;;  %vm64_vm1 = vweird.f32 %v114_v11 }
  0x90   :  { %115 = vrsqrt.f32 %v56_v12  ;;  %vm65_vm3 = vmor %vm63_vm2, %vm64_vm1  ;;  %vm73_vm5 = vweird.f32 %v56_v12 }
  0x91   :  { %v59_v14 = vmul.f32 %v114_v11, %v58_v13 }
  0x93   :  { %v60_v15 = vmul.f32 0.5, %v59_v14 }
  0x95   :  { %v61_v16 = vsub.f32 1.5, %v60_v15 }
  0x96   :  { %v116_v17 = vpop.eup %115 }
  0x97   :  { %v62_v18 = vmul.f32 %v114_v11, %v61_v16  ;;  %v68_v19 = vmul.f32 %v116_v17, %v56_v12  ;;  %vm74_vm4 = vweird.f32 %v116_v17 }
  0x98   :  { %vm75_vm6 = vmor %vm73_vm5, %vm74_vm4 }
  0x99   :  { %v66_v21 = vsel %vm65_vm3, %v114_v11, %v62_v18  ;;  %v69_v22 = vmul.f32 %v116_v17, %v68_v19 }
  0x9a   :  { %v78_v23 = vmul.f32 %v66_v21, %v42_v0 }
  0x9b   :  { %v70_v24 = vmul.f32 0.5, %v69_v22 }
  0x9c   :  { %v83_v25 = vmul.f32 %v112_v20, %v78_v23 }
  0x9d   :  { %v71_v26 = vsub.f32 1.5, %v70_v24 }
  0x9e   :  { %85 = vst.msk [vmem:[#allocation7] sm:$0xff] %vm46_vm0, %v83_v25 }
  0x9f   :  { %v72_v27 = vmul.f32 %v116_v17, %v71_v26 }
  0xa1   :  { %v76_v28 = vsel %vm75_vm6, %v116_v17, %v72_v27 }
  0xa2   :  { %v79_v29 = vmul.f32 %v76_v28, %v43_v2 }
  0xa4   :  { %v84_v30 = vmul.f32 %v112_v20, %v79_v29 }
  0xa6   :  { %86 = vst.msk [vmem:[#allocation7 + $0x8] sm:$0xff] %vm46_vm0, %v84_v30 }
  0xa7   :  { %99 = dma.vmem_to_hbm [thread:$0]  %s92_s1, 256, %s94_s23, [#allocation4], %s196_s17, %s196_s17, %s197_s18  }
  0xa8   :  { %193 = dma.done.wait [#allocation4], 256  }
  0xa9   :  { %194 = vsyncadd [#allocation4], 4294967040 }
  0xaa   :  { %104 = vsyncpa [#allocation3], 1 }
  0xab   :  { %105 = vsyncpa [#allocation6], 1 }
  0xac   :  { %106 = vsyncpa [#allocation4], 1 }

</bundles_post_ra>
